<compile_context>
chip_gen: v5e
topology: v5e:2x2
jax: 0.10.0
libtpu: 0.0.40
codegen_flags: <defaults>
</compile_context>

<pallas_src>
import jax
import jax.numpy as jnp
from jax.experimental import pallas as pl
from jax.experimental.pallas import tpu as pltpu


def gcn_kernel(a_ref, x_ref, w1_ref, b1_ref, w2_ref, b2_ref, o_ref):
    """Fused 2-layer GCN forward.

    h1  = relu((A_hat @ X) @ W1 + b1)        # aggregate-first (in < out)
    out =  A_hat @ (h1 @ W2) + b2            # project-first
    Equivalent to DGL GraphConv(norm='both') x2 with ReLU in between.
    """
    a = a_ref[...]                                                   # [N, N] bf16

    # ---- layer 1: aggregate -> linear -> bias -> relu -------------------
    ax = jnp.dot(a, x_ref[...], preferred_element_type=jnp.float32)  # [N, IN] f32
    h1 = jnp.dot(ax.astype(jnp.bfloat16), w1_ref[...],
                 preferred_element_type=jnp.float32) + b1_ref[...]   # [N, Hp] f32
    h1 = jnp.maximum(h1, 0.0)

    # ---- layer 2: linear -> aggregate -> bias ---------------------------
    hw = jnp.dot(h1.astype(jnp.bfloat16), w2_ref[...],
                 preferred_element_type=jnp.float32)                 # [N, Hp] f32
    o_ref[...] = jnp.dot(a, hw.astype(jnp.bfloat16),
                         preferred_element_type=jnp.float32) + b2_ref[...]


def gcn_forward(a_hat, x, w1, b1, w2, b2, *, lane=128):
    n, in_feats = x.shape
    h_feats = w2.shape[1]
    h_pad = pl.cdiv(h_feats, lane) * lane                            # lane-dense width

    # Zero-pad the hidden/output feature dim (exact) and cast matmul operands
    # to bf16 (f32 accumulation happens inside the kernel).
    a_bf = a_hat.astype(jnp.bfloat16)
    x_bf = x.astype(jnp.bfloat16)
    w1_p = jnp.zeros((in_feats, h_pad), jnp.bfloat16).at[:, :h_feats].set(
        w1.astype(jnp.bfloat16))
    w2_p = jnp.zeros((h_pad, h_pad), jnp.bfloat16).at[:h_feats, :h_feats].set(
        w2.astype(jnp.bfloat16))
    b1_p = jnp.zeros((1, h_pad), jnp.float32).at[:, :h_feats].set(
        b1.reshape(1, -1).astype(jnp.float32))
    b2_p = jnp.zeros((1, h_pad), jnp.float32).at[:, :h_feats].set(
        b2.reshape(1, -1).astype(jnp.float32))

    flops = 2.0 * (n * n * in_feats          # A @ X
                   + n * in_feats * h_pad    # (A@X) @ W1
                   + n * h_pad * h_pad       # h1 @ W2
                   + n * n * h_pad)          # A @ (h1@W2)
    bytes_accessed = (a_bf.size * 2 + x_bf.size * 2 + w1_p.size * 2
                      + w2_p.size * 2 + b1_p.size * 4 + b2_p.size * 4
                      + n * h_pad * 4)

    out_p = pl.pallas_call(
        gcn_kernel,
        out_shape=jax.ShapeDtypeStruct((n, h_pad), jnp.float32),
        in_specs=[pl.BlockSpec(memory_space=pltpu.MemorySpace.VMEM)] * 6,
        out_specs=pl.BlockSpec(memory_space=pltpu.MemorySpace.VMEM),
        cost_estimate=pl.CostEstimate(
            flops=int(flops), transcendentals=0,
            bytes_accessed=int(bytes_accessed)),
    )(a_bf, x_bf, w1_p, b1_p, w2_p, b2_p)

    return out_p[:, :h_feats]


def build_normalized_adjacency(adj):
    """D^{-1/2} A D^{-1/2} with degree clamped to >= 1 (DGL norm='both')."""
    deg = jnp.sum(adj, axis=1)
    deg = jnp.clip(deg, 1.0, None)
    inv_sqrt = 1.0 / jnp.sqrt(deg)
    return adj * inv_sqrt[:, None] * inv_sqrt[None, :]


def reference_gcn(a_hat, x, w1, b1, w2, b2):
    h = a_hat @ (x @ w1) + b1.reshape(1, -1)
    h = jnp.maximum(h, 0.0)
    return a_hat @ (h @ w2) + b2.reshape(1, -1)


if __name__ == "__main__":
    key = jax.random.PRNGKey(0)
    N = 64          # number of graph nodes
    IN_FEATS = 16   # input feature dim
    H_FEATS = 32    # hidden / output feature dim

    k_adj, k_x, k_w1, k_w2 = jax.random.split(key, 4)

    # Deterministic small undirected graph: random symmetric adjacency,
    # no self loops (GraphConv does not add them by default).
    rand = jax.random.uniform(k_adj, (N, N))
    adj = (rand < 0.1).astype(jnp.float32)
    adj = jnp.maximum(adj, adj.T)                       # symmetrize
    adj = adj * (1.0 - jnp.eye(N, dtype=jnp.float32))   # drop self loops
    a_hat = build_normalized_adjacency(adj)

    # Node features and GraphConv parameters (Glorot-style scaling, bias=0).
    x = jax.random.normal(k_x, (N, IN_FEATS), dtype=jnp.float32)
    w1 = jax.random.normal(k_w1, (IN_FEATS, H_FEATS), dtype=jnp.float32) * (
        1.0 / jnp.sqrt(jnp.float32(IN_FEATS))
    )
    b1 = jnp.zeros((H_FEATS,), dtype=jnp.float32)
    w2 = jax.random.normal(k_w2, (H_FEATS, H_FEATS), dtype=jnp.float32) * (
        1.0 / jnp.sqrt(jnp.float32(H_FEATS))
    )
    b2 = jnp.zeros((H_FEATS,), dtype=jnp.float32)

    out = gcn_forward(a_hat, x, w1, b1, w2, b2)
    out = jax.block_until_ready(out)

    ref = reference_gcn(a_hat, x, w1, b1, w2, b2)
    assert out.shape == (N, H_FEATS)
    # bf16 MXU operands (f32 accumulation) -> loosened tolerance vs f32 ref.
    assert jnp.allclose(out, ref, atol=5e-2, rtol=5e-2), "mismatch vs JAX reference"

    print("KERNEL_OK")
</pallas_src>

<mosaic_0001>
module attributes {stable_mosaic.version = 11 : i64} {
  func.func @gcn_kernel(%arg0: memref<64x64xbf16, #tpu.memory_space<vmem>>, %arg1: memref<64x16xbf16, #tpu.memory_space<vmem>>, %arg2: memref<16x128xbf16, #tpu.memory_space<vmem>>, %arg3: memref<1x128xf32, #tpu.memory_space<vmem>>, %arg4: memref<128x128xbf16, #tpu.memory_space<vmem>>, %arg5: memref<1x128xf32, #tpu.memory_space<vmem>>, %arg6: memref<64x128xf32, #tpu.memory_space<vmem>>) attributes {dimension_semantics = [], scalar_prefetch = 0 : i64, scratch_operands = 0 : i64, tpu.core_type = #tpu.core_type<tc>} {
    %c0 = arith.constant 0 : index
    %c0_0 = arith.constant 0 : index
    %0 = vector.load %arg0[%c0, %c0_0] : memref<64x64xbf16, #tpu.memory_space<vmem>>, vector<64x64xbf16>
    %c0_1 = arith.constant 0 : index
    %c0_2 = arith.constant 0 : index
    %1 = vector.load %arg1[%c0_1, %c0_2] : memref<64x16xbf16, #tpu.memory_space<vmem>>, vector<64x16xbf16>
    %cst = arith.constant dense<0.000000e+00> : vector<64x16xf32>
    %2 = tpu.matmul %0, %1, %cst {dimension_numbers = #tpu.dot_dimension_numbers<[1], [0], [0], [1], [0, 0, 1, 1], [], []>} : vector<64x64xbf16>, vector<64x16xbf16>, vector<64x16xf32> -> vector<64x16xf32>
    %3 = arith.truncf %2 : vector<64x16xf32> to vector<64x16xbf16>
    %c0_3 = arith.constant 0 : index
    %c0_4 = arith.constant 0 : index
    %4 = vector.load %arg2[%c0_3, %c0_4] : memref<16x128xbf16, #tpu.memory_space<vmem>>, vector<16x128xbf16>
    %cst_5 = arith.constant dense<0.000000e+00> : vector<64x128xf32>
    %5 = tpu.matmul %3, %4, %cst_5 {dimension_numbers = #tpu.dot_dimension_numbers<[1], [0], [0], [1], [0, 0, 1, 1], [], []>} : vector<64x16xbf16>, vector<16x128xbf16>, vector<64x128xf32> -> vector<64x128xf32>
    %c0_6 = arith.constant 0 : index
    %c0_7 = arith.constant 0 : index
    %6 = vector.load %arg3[%c0_6, %c0_7] : memref<1x128xf32, #tpu.memory_space<vmem>>, vector<1x128xf32>
    %7 = vector.broadcast %6 : vector<1x128xf32> to vector<64x128xf32>
    %8 = arith.addf %5, %7 : vector<64x128xf32>
    %cst_8 = arith.constant 0.000000e+00 : f32
    %9 = vector.broadcast %cst_8 : f32 to vector<64x128xf32>
    %10 = arith.maximumf %8, %9 : vector<64x128xf32>
    %11 = arith.truncf %10 : vector<64x128xf32> to vector<64x128xbf16>
    %c0_9 = arith.constant 0 : index
    %c0_10 = arith.constant 0 : index
    %12 = vector.load %arg4[%c0_9, %c0_10] : memref<128x128xbf16, #tpu.memory_space<vmem>>, vector<128x128xbf16>
    %cst_11 = arith.constant dense<0.000000e+00> : vector<64x128xf32>
    %13 = tpu.matmul %11, %12, %cst_11 {dimension_numbers = #tpu.dot_dimension_numbers<[1], [0], [0], [1], [0, 0, 1, 1], [], []>} : vector<64x128xbf16>, vector<128x128xbf16>, vector<64x128xf32> -> vector<64x128xf32>
    %14 = arith.truncf %13 : vector<64x128xf32> to vector<64x128xbf16>
    %cst_12 = arith.constant dense<0.000000e+00> : vector<64x128xf32>
    %15 = tpu.matmul %0, %14, %cst_12 {dimension_numbers = #tpu.dot_dimension_numbers<[1], [0], [0], [1], [0, 0, 1, 1], [], []>} : vector<64x64xbf16>, vector<64x128xbf16>, vector<64x128xf32> -> vector<64x128xf32>
    %c0_13 = arith.constant 0 : index
    %c0_14 = arith.constant 0 : index
    %16 = vector.load %arg5[%c0_13, %c0_14] : memref<1x128xf32, #tpu.memory_space<vmem>>, vector<1x128xf32>
    %17 = vector.broadcast %16 : vector<1x128xf32> to vector<64x128xf32>
    %18 = arith.addf %15, %17 : vector<64x128xf32>
    %c0_15 = arith.constant 0 : index
    %c0_16 = arith.constant 0 : index
    %19 = vector.load %arg6[%c0_15, %c0_16] : memref<64x128xf32, #tpu.memory_space<vmem>>, vector<64x128xf32>
    tpu.vector_store %arg6[%c0_15, %c0_16], %18 {strides = array<i32>} : memref<64x128xf32, #tpu.memory_space<vmem>>, vector<64x128xf32>,
    return
  }
}

</mosaic_0001>

<bundles_post_ra>
// kernel: tpu_custom_call.1
= control target key start
LH: loop header
LB: loop body
LE: loop exit
PB: predicated region body
PF: predicated region fallthrough
CT: control target
= control target key end

     0   :  { %11 = vsyncpa [#allocation3], 0  ;;  %s635_s0 = inlined_call_operand.vmem [shape: bf16[64,64], index: 0, kind: input, shape index: {}]   ;;  %s636_s1 = inlined_call_operand.vmem [shape: bf16[64,16], index: 1, kind: input, shape index: {}]   ;;  %s637_s2 = inlined_call_operand.vmem [shape: bf16[16,128], index: 2, kind: input, shape index: {}]   ;;  %s638_s3 = inlined_call_operand.vmem [shape: f32[1,128], index: 3, kind: input, shape index: {}]   ;;  %s639_s4 = inlined_call_operand.hbm [shape: bf16[128,128], index: 4, kind: input, shape index: {}]   ;;  %s640_s5 = inlined_call_operand.vmem [shape: f32[1,128], index: 5, kind: input, shape index: {}]   ;;  %s641_s6 = inlined_call_operand.hbm [shape: f32[64,128], index: 6, kind: output, shape index: {}]  }
   0x1   :  { %12 = vsyncpa [#allocation4], 0  ;;  %s25_s23 = sshll.u32 %s639_s4, 4  ;;  %s527_s24 = smov [#allocation2]   ;;  %s26_s23 = int_to_ptr.hbm [resolvable:$true] %s25_s23 }
   0x2   :  { %s27_s25 = sshll.u32 %s527_s24, 4  ;;  %s528_s26 = smov 64   ;;  %s28_s25 = int_to_ptr.vmem [resolvable:$true] %s27_s25 }
   0x3   :  { %s529_s27 = smov 4  }
   0x4   :  { %33 = dma.hbm_to_vmem [thread:$0]  %s26_s23, 1024, %s28_s25, [#allocation3], %s528_s26, %s528_s26, %s529_s27  }
   0x5   :  { %523 = dma.done.wait [#allocation3], 1024  }
   0x6   :  { %524 = vsyncadd [#allocation3], 4294966272  ;;  %v457_v0 = vld [vmem:[%s636_s1 + $0x18] sm:$0xff]  ;;  %v456_v1 = vld [vmem:[%s636_s1 + $0x10] sm:$0xff]  ;;  %vm101_vm0 = vcmask 523264   ;;  %vm159_vm1 = vcmask 130048  }
   0x7   :  { %118 = vmatpush.bf16.msra.mxu0 %v457_v0  ;;  %v455_v2 = vld [vmem:[%s636_s1 + $0x8] sm:$0xff]  ;;  %v454_v3 = vld [vmem:[%s636_s1] sm:$0xff]  ;;  %v600_v6 = vld [vmem:[%s635_s0 + $0x10] sm:$0xff]  ;;  %s357_s24 = sshll.u32 %s641_s6, 4  ;;  %s531_s25 = smov 128   ;;  %s358_s24 = int_to_ptr.hbm [resolvable:$true] %s357_s24 }
   0x8   :  { %v586_v4 = vld [vmem:[%s635_s0] sm:$0xff]  ;;  %v593_v5 = vld [vmem:[%s635_s0 + $0x8] sm:$0xff]  ;;  %v607_v7 = vld [vmem:[%s635_s0 + $0x18] sm:$0xff]  ;;  %s532_s26 = smov 8  }
   0x9   :  { %v458_v8 = vld [vmem:[%s637_s2] sm:$0xff]  ;;  %v466_v15 = vld [vmem:[#allocation2 + $0x38] sm:$0xff]  ;;  %v465_v16 = vld [vmem:[#allocation2 + $0x30] sm:$0xff] }
   0xa   :  { %179 = vmatpush.bf16.msra.mxu1 %v458_v8  ;;  %277 = vmatpush.bf16.msra.mxu2 %v466_v15  ;;  %v464_v18 = vld [vmem:[#allocation2 + $0x28] sm:$0xff]  ;;  %v463_v19 = vld [vmem:[#allocation2 + $0x20] sm:$0xff]  ;;  %v462_v25 = vld [vmem:[#allocation2 + $0x18] sm:$0xff] }
   0xb   :  { %119 = vmatpush.bf16.msra.mxu0 %v456_v1  ;;  %v461_v26 = vld [vmem:[#allocation2 + $0x10] sm:$0xff]  ;;  %v460_v27 = vld [vmem:[#allocation2 + $0x8] sm:$0xff]  ;;  %v459_v28 = vld [vmem:[#allocation2] sm:$0xff] }
   0xc   :  { %v473_v30 = vld [vmem:[%s638_s3] ss:$0 sm:$0xff] }
   0xe   :  { %278 = vmatpush.bf16.msra.mxu2 %v465_v16 }
   0xf   :  { %120 = vmatpush.bf16.msra.mxu0 %v455_v2 }
  0x12   :  { %279 = vmatpush.bf16.msra.mxu2 %v464_v18 }
  0x13   :  { %121 = vmatpush.bf16.msra.mxu0 %v454_v3 }
  0x16   :  { %402 = vmatmul.msk.bf16.vlgmr.msra.gmra.mxu0 %vm101_vm0, %v586_v4  ;;  %280 = vmatpush.bf16.msra.mxu2 %v463_v19 }
  0x1a   :  { %281 = vmatpush.bf16.msra.mxu2 %v462_v25 }
  0x1e   :  { %282 = vmatpush.bf16.msra.mxu2 %v461_v26 }
  0x22   :  { %283 = vmatpush.bf16.msra.mxu2 %v460_v27 }
  0x26   :  { %403 = vmatmul.msk.bf16.gmra.mxu0 %vm101_vm0, %v593_v5  ;;  %284 = vmatpush.bf16.msra.mxu2 %v459_v28 }
  0x36   :  { %404 = vmatmul.msk.bf16.gmra.mxu0 %vm101_vm0, %v600_v6 }
  0x46   :  { %405 = vmatmul.msk.bf16.gmra.mxu0 %vm101_vm0, %v607_v7 }
  0x93   :  { %v123_v9 = vpop.f32.mrf.mxu0 }
  0x9b   :  { %v125_v10 = vpop.f32.mrf.mxu0 }
  0x9c   :  { %v143_v11 = vpack.c.bf16 %v125_v10, %v123_v9  ;;  %v474_v10 = vld [vmem:[%s640_s5] ss:$0 sm:$0xff]  ;;  %s530_s5 = smov [#allocation5]  }
  0x9d   :  { %s355_s21 = sshll.u32 %s530_s5, 4  ;;  %s356_s21 = int_to_ptr.vmem [resolvable:$true] %s355_s21 }
  0x9e   :  { %410 = vmatmul.msk.bf16.vlgmr.msra.gmra.mxu1 %vm159_vm1, %v143_v11 }
  0xa3   :  { %v128_v12 = vpop.f32.mrf.mxu0 }
  0xab   :  { %v130_v13 = vpop.f32.mrf.mxu0 }
  0xac   :  { %v144_v14 = vpack.c.bf16 %v130_v13, %v128_v12 }
  0xae   :  { %411 = vmatmul.msk.bf16.gmra.mxu1 %vm159_vm1, %v144_v14 }
  0xb3   :  { %v133_v17 = vpop.f32.mrf.mxu0 }
  0xbb   :  { %v135_v20 = vpop.f32.mrf.mxu0 }
  0xbc   :  { %v145_v21 = vpack.c.bf16 %v135_v20, %v133_v17 }
  0xbe   :  { %412 = vmatmul.msk.bf16.gmra.mxu1 %vm159_vm1, %v145_v21 }
  0xc3   :  { %v138_v22 = vpop.f32.mrf.mxu0 }
  0xcb   :  { %v140_v23 = vpop.f32.mrf.mxu0 }
  0xcc   :  { %v146_v24 = vpack.c.bf16 %v140_v23, %v138_v22 }
  0xce   :  { %413 = vmatmul.msk.bf16.gmra.mxu1 %vm159_vm1, %v146_v24 }
 0x11b   :  { %v181_v29 = vpop.f32.mrf.mxu1 }
 0x11c   :  { %v182_v31 = vadd.f32 %v473_v30, %v181_v29 }
 0x11e   :  { %v201_v34 = vmax.f32 %v182_v31, 0.0 }
 0x123   :  { %v183_v32 = vpop.f32.mrf.mxu1 }
 0x124   :  { %v184_v33 = vadd.f32 %v473_v30, %v183_v32 }
 0x126   :  { %v202_v35 = vmax.f32 %v184_v33, 0.0 }
 0x128   :  { %v209_v36 = vpack.c.bf16 %v202_v35, %v201_v34 }
 0x12a   :  { %285 = vmatmul.bf16.vlgmr.msra.gmra.mxu2 %v209_v36 }
 0x12b   :  { %v186_v37 = vpop.f32.mrf.mxu1 }
 0x12c   :  { %v187_v38 = vadd.f32 %v473_v30, %v186_v37 }
 0x12e   :  { %v203_v41 = vmax.f32 %v187_v38, 0.0 }
 0x133   :  { %v188_v39 = vpop.f32.mrf.mxu1 }
 0x134   :  { %v189_v40 = vadd.f32 %v473_v30, %v188_v39 }
 0x136   :  { %v204_v42 = vmax.f32 %v189_v40, 0.0 }
 0x138   :  { %v210_v43 = vpack.c.bf16 %v204_v42, %v203_v41 }
 0x13a   :  { %290 = vmatmul.bf16.gmra.mxu2 %v210_v43 }
 0x13b   :  { %v191_v44 = vpop.f32.mrf.mxu1 }
 0x13c   :  { %v192_v45 = vadd.f32 %v473_v30, %v191_v44 }
 0x13e   :  { %v205_v48 = vmax.f32 %v192_v45, 0.0 }
 0x143   :  { %v193_v46 = vpop.f32.mrf.mxu1 }
 0x144   :  { %v194_v47 = vadd.f32 %v473_v30, %v193_v46 }
 0x146   :  { %v206_v49 = vmax.f32 %v194_v47, 0.0 }
 0x148   :  { %v211_v50 = vpack.c.bf16 %v206_v49, %v205_v48 }
 0x14a   :  { %295 = vmatmul.bf16.gmra.mxu2 %v211_v50 }
 0x14b   :  { %v196_v51 = vpop.f32.mrf.mxu1 }
 0x14c   :  { %v197_v52 = vadd.f32 %v473_v30, %v196_v51 }
 0x14e   :  { %v207_v55 = vmax.f32 %v197_v52, 0.0 }
 0x153   :  { %v198_v53 = vpop.f32.mrf.mxu1 }
 0x154   :  { %v199_v54 = vadd.f32 %v473_v30, %v198_v53 }
 0x156   :  { %v208_v56 = vmax.f32 %v199_v54, 0.0 }
 0x158   :  { %v212_v57 = vpack.c.bf16 %v208_v56, %v207_v55 }
 0x15a   :  { %300 = vmatmul.bf16.gmra.mxu2 %v212_v57 }
 0x1ad   :  { %v286_v58 = vpop.f32.mrf.mxu2 }
 0x1b5   :  { %v288_v59 = vpop.f32.mrf.mxu2 }
 0x1b6   :  { %v306_v9 = vpack.c.bf16 %v288_v59, %v286_v58 }
 0x1bd   :  { %v291_v60 = vpop.f32.mrf.mxu2 }
 0x1c5   :  { %v293_v61 = vpop.f32.mrf.mxu2 }
 0x1c6   :  { %v307_v8 = vpack.c.bf16 %v293_v61, %v291_v60 }
 0x1cd   :  { %v296_v62 = vpop.f32.mrf.mxu2 }
 0x1d5   :  { %v298_v63 = vpop.f32.mrf.mxu2 }
 0x1d6   :  { %v308_v3 = vpack.c.bf16 %v298_v63, %v296_v62 }
 0x1dd   :  { %v301_v0 = vpop.f32.mrf.mxu2 }
 0x1e5   :  { %v303_v1 = vpop.f32.mrf.mxu2 }
 0x1e6   :  { %v309_v2 = vpack.c.bf16 %v303_v1, %v301_v0 }
 0x1e8   :  { %318 = vmatpush.bf16.msra.mxu3 %v309_v2 }
 0x1ec   :  { %319 = vmatpush.bf16.msra.mxu3 %v308_v3 }
 0x1f0   :  { %320 = vmatpush.bf16.msra.mxu3 %v307_v8 }
 0x1f4   :  { %321 = vmatpush.bf16.msra.mxu3 %v306_v9 }
 0x1f7   :  { %446 = vmatmul.msk.bf16.vlgmr.msra.gmra.mxu3 %vm101_vm0, %v586_v4 }
 0x207   :  { %447 = vmatmul.msk.bf16.gmra.mxu3 %vm101_vm0, %v593_v5 }
 0x217   :  { %448 = vmatmul.msk.bf16.gmra.mxu3 %vm101_vm0, %v600_v6 }
 0x227   :  { %449 = vmatmul.msk.bf16.gmra.mxu3 %vm101_vm0, %v607_v7 }
 0x27a   :  { %v323_v11 = vpop.f32.mrf.mxu3 }
 0x27b   :  { %v324_v12 = vadd.f32 %v474_v10, %v323_v11 }
 0x27d   :  { %343 = vst [vmem:[#allocation5] sm:$0xff] %v324_v12 }
 0x282   :  { %v325_v13 = vpop.f32.mrf.mxu3 }
 0x283   :  { %v326_v14 = vadd.f32 %v474_v10, %v325_v13 }
 0x285   :  { %344 = vst [vmem:[#allocation5 + $0x8] sm:$0xff] %v326_v14 }
 0x28a   :  { %v328_v4 = vpop.f32.mrf.mxu3 }
 0x28b   :  { %v329_v15 = vadd.f32 %v474_v10, %v328_v4 }
 0x28d   :  { %345 = vst [vmem:[#allocation5 + $0x10] sm:$0xff] %v329_v15 }
 0x292   :  { %v330_v5 = vpop.f32.mrf.mxu3 }
 0x293   :  { %v331_v16 = vadd.f32 %v474_v10, %v330_v5 }
 0x295   :  { %346 = vst [vmem:[#allocation5 + $0x18] sm:$0xff] %v331_v16 }
 0x29a   :  { %v333_v6 = vpop.f32.mrf.mxu3 }
 0x29b   :  { %v334_v17 = vadd.f32 %v474_v10, %v333_v6 }
 0x29d   :  { %347 = vst [vmem:[#allocation5 + $0x20] sm:$0xff] %v334_v17 }
 0x2a2   :  { %v335_v7 = vpop.f32.mrf.mxu3 }
 0x2a3   :  { %v336_v18 = vadd.f32 %v474_v10, %v335_v7 }
 0x2a5   :  { %348 = vst [vmem:[#allocation5 + $0x28] sm:$0xff] %v336_v18 }
 0x2aa   :  { %v338_v19 = vpop.f32.mrf.mxu3 }
 0x2ab   :  { %v339_v20 = vadd.f32 %v474_v10, %v338_v19 }
 0x2ad   :  { %349 = vst [vmem:[#allocation5 + $0x30] sm:$0xff] %v339_v20 }
 0x2b2   :  { %v340_v21 = vpop.f32.mrf.mxu3 }
 0x2b3   :  { %v341_v22 = vadd.f32 %v474_v10, %v340_v21 }
 0x2b5   :  { %350 = vst [vmem:[#allocation5 + $0x38] sm:$0xff] %v341_v22 }
 0x2b6   :  { %363 = dma.vmem_to_hbm [thread:$0]  %s356_s21, 1024, %s358_s24, [#allocation4], %s531_s25, %s531_s25, %s532_s26  }
 0x2b7   :  { %525 = dma.done.wait [#allocation4], 1024  }
 0x2b8   :  { %526 = vsyncadd [#allocation4], 4294966272 }
 0x2b9   :  { %368 = vsyncpa [#allocation3], 1 }
 0x2ba   :  { %369 = vsyncpa [#allocation4], 1 }

</bundles_post_ra>
